<compile_context>
chip_gen: v7x
topology: tpu7x:2x2x1
jax: 0.10.0
libtpu: 0.0.40
codegen_flags: <defaults>
</compile_context>

<pallas_src>
import numpy as np
import jax
import jax.numpy as jnp
from jax.experimental import pallas as pl
from jax.experimental.pallas import tpu as pltpu

# ---- small-model configuration (analog of VGG16 + IMGNet head) -----------------
B = 2              # batch
C_IN = 4           # input channels
HW = 16            # input spatial size
C1, C2 = 8, 16     # conv channels ("features" analog)
H2 = HW // 2       # spatial size after pool1 (8)
H4 = HW // 4       # spatial size after pool2 (4)
FLAT = H4 * H4 * C2            # 256  (analog of 25088)
HID = 32                       # analog of 4096 (classifier hidden size == `dim`)
LABEL_SIZE = 10
CODE_LENGTH = 16
LANES = 128

K1 = 3 * HW * C_IN             # 192  conv1 fused-tap contraction depth
N1 = HW * C1                   # 128  conv1 output lanes (W*C1)
K2 = 3 * H2 * C1               # 192  conv2 fused-tap contraction depth
N2 = H2 * C2                   # 128  conv2 output lanes (W*C2)

# ---- weight-slab row offsets (single bf16 parameter slab, 128 lanes wide) --------
OFF_M1 = 0
OFF_M2 = OFF_M1 + K1           # 192
OFF_PC1 = OFF_M2 + K2          # 384   pool1 column-selection (even|odd) block
OFF_PC2 = OFF_PC1 + N1         # 512   pool2 column-selection block
OFF_FC1 = OFF_PC2 + N2         # 640
OFF_FC2 = OFF_FC1 + FLAT       # 896
OFF_FEAT = OFF_FC2 + HID       # 928
OFF_CH = OFF_FEAT + HID        # 960   fused [hash | classifier] projection (padded)
W_ROWS = OFF_CH + HID          # 992

VMEM = pltpu.MemorySpace.VMEM


# =========================== fused Pallas kernel ================================

def imgnet_fused_kernel(
    x_ref,                       # (B*HW, HW*C_IN)  f32   all images stacked on sublanes
    w_ref,                       # (W_ROWS, 128)    bf16  single weight slab
    b_ref,                       # (8, 128)         f32   single bias slab
    out_ref,                     # (B, 128)         f32   [ tanh-hash | softmax | 0pad ]
    im1_ref,                     # scratch (B*HW, K1)  bf16  conv1 im2col
    act1_ref,                    # scratch (B*HW, N1)  f32   conv1 relu out
    im2_ref,                     # scratch (B*H2, K2)  bf16  conv2 im2col
    act2_ref,                    # scratch (B*H2, N2)  f32   conv2 relu out
    flat_ref,                    # scratch (B, FLAT)   bf16  flattened features
):
    f32 = jnp.float32
    bf16 = jnp.bfloat16
    NR1 = B * HW                 # 32 conv1 rows (all images)
    NR2 = B * H2                 # 16 conv2 rows / pool1 output rows
    NR3 = B * H4                 # 8  pool2 output rows
    L1 = HW * C_IN               # 64 lanes per conv1 tap
    L2 = H2 * C1                 # 64 lanes per conv2 tap
    FB = H4 * C2                 # 64 lanes per pooled row in the flatten

    def mm(a, b):                # bf16 operands on the MXU, f32 accumulation
        return jnp.dot(a, b, preferred_element_type=f32)

    # Zero the im2col scratches once: image-top/bottom halo rows stay zero.
    im1_ref[...] = jnp.zeros_like(im1_ref)
    im2_ref[...] = jnp.zeros_like(im2_ref)

    # ---------- conv1: 3x3 pad-1 conv as ONE (32,192)@(192,128) matmul -------------
    xb = x_ref[...].astype(bf16)                               # cast activations once
    im1_ref[:, L1:2 * L1] = xb                                  # dy = 1 (center tap)
    im1_ref[1:NR1, 0:L1] = xb[0:NR1 - 1, :]                     # dy = 0 (row above)
    im1_ref[HW:HW + 1, 0:L1] = jnp.zeros((1, L1), bf16)         # cross-image boundary
    im1_ref[0:NR1 - 1, 2 * L1:3 * L1] = xb[1:NR1, :]            # dy = 2 (row below)
    im1_ref[HW - 1:HW, 2 * L1:3 * L1] = jnp.zeros((1, L1), bf16)

    a1 = mm(im1_ref[...], w_ref[OFF_M1:OFF_M1 + K1, :])         # (32, 128) f32
    act1_ref[...] = jnp.maximum(a1 + b_ref[0:1, :], 0.0)

    # ---------- maxpool1: rows on the VPU (strided reads), columns via matmul ------
    v1 = jnp.maximum(act1_ref[pl.ds(0, NR2, 2), :],
                     act1_ref[pl.ds(1, NR2, 2), :]).astype(bf16)          # (16, 128)
    pc1 = w_ref[OFF_PC1:OFF_PC1 + N1, :]
    p1b = jnp.maximum(mm(v1, pc1[:, 0:N1 // 2]),
                      mm(v1, pc1[:, N1 // 2:N1])).astype(bf16)            # (16, 64)

    # ---------- conv2: ONE (16,192)@(192,128) matmul --------------------------------
    im2_ref[:, L2:2 * L2] = p1b                                 # dy = 1
    im2_ref[1:NR2, 0:L2] = p1b[0:NR2 - 1, :]                    # dy = 0
    im2_ref[H2:H2 + 1, 0:L2] = jnp.zeros((1, L2), bf16)
    im2_ref[0:NR2 - 1, 2 * L2:3 * L2] = p1b[1:NR2, :]           # dy = 2
    im2_ref[H2 - 1:H2, 2 * L2:3 * L2] = jnp.zeros((1, L2), bf16)

    a2 = mm(im2_ref[...], w_ref[OFF_M2:OFF_M2 + K2, :])         # (16, 128) f32
    act2_ref[...] = jnp.maximum(a2 + b_ref[1:2, :], 0.0)

    # ---------- maxpool2 -------------------------------------------------------------
    v2 = jnp.maximum(act2_ref[pl.ds(0, NR3, 2), :],
                     act2_ref[pl.ds(1, NR3, 2), :]).astype(bf16)          # (8, 128)
    pc2 = w_ref[OFF_PC2:OFF_PC2 + N2, :]
    p2b = jnp.maximum(mm(v2, pc2[:, 0:N2 // 2]),
                      mm(v2, pc2[:, N2 // 2:N2])).astype(bf16)            # (8, 64)

    # ---------- flatten (NHWC order) via lane-offset stores -> one FC1 matmul --------
    for b in range(B):
        for q in range(H4):
            flat_ref[b:b + 1, q * FB:(q + 1) * FB] = p2b[b * H4 + q:b * H4 + q + 1, :]

    # ---------- dense head (single fused chain, M = B) --------------------------------
    h = mm(flat_ref[...], w_ref[OFF_FC1:OFF_FC1 + FLAT, 0:HID]) + b_ref[2:3, 0:HID]
    h = jnp.maximum(h, 0.0)                                            # classifier[0]+ReLU
    h = mm(h.astype(bf16), w_ref[OFF_FC2:OFF_FC2 + HID, 0:HID]) + b_ref[3:4, 0:HID]
    h = jnp.maximum(h, 0.0)                                            # classifier[3]+ReLU
    feat = mm(h.astype(bf16), w_ref[OFF_FEAT:OFF_FEAT + HID, 0:HID]) + b_ref[4:5, 0:HID]
    feat = jnp.maximum(feat, 0.0)                                      # feature+ReLU

    # fused [hash | classifier | zero-pad] projection -> lane-dense (B, 128)
    ch = mm(feat.astype(bf16), w_ref[OFF_CH:OFF_CH + HID, :]) + b_ref[5:6, :]

    lane = jax.lax.broadcasted_iota(jnp.int32, (B, LANES), 1)
    is_cls = jnp.logical_and(lane >= CODE_LENGTH, lane < CODE_LENGTH + LABEL_SIZE)
    masked = jnp.where(is_cls, ch, -jnp.inf)
    mx = jnp.max(masked, axis=1, keepdims=True)
    e = jnp.exp(masked - mx)                      # exactly 0 outside the class lanes
    probs = e / jnp.sum(e, axis=1, keepdims=True)  # exact normalization
    out_ref[...] = jnp.where(lane < CODE_LENGTH, jnp.tanh(ch), probs)


# =========================== wrapper ============================================

def imgnet_forward(x_nchw, pk):
    """Returns (hash_code, img_predict), matching the PyTorch module's outputs."""
    x = jnp.transpose(x_nchw, (0, 2, 3, 1)).astype(jnp.float32)   # NCHW -> NHWC
    x2d = x.reshape(B * HW, HW * C_IN)                            # images stacked on rows

    out = pl.pallas_call(
        imgnet_fused_kernel,
        out_shape=jax.ShapeDtypeStruct((B, LANES), jnp.float32),
        in_specs=[pl.BlockSpec(memory_space=VMEM)] * 3,
        out_specs=pl.BlockSpec(memory_space=VMEM),
        scratch_shapes=[
            pltpu.VMEM((B * HW, K1), jnp.bfloat16),   # conv1 im2col
            pltpu.VMEM((B * HW, N1), jnp.float32),    # conv1 relu out (row-pool source)
            pltpu.VMEM((B * H2, K2), jnp.bfloat16),   # conv2 im2col
            pltpu.VMEM((B * H2, N2), jnp.float32),    # conv2 relu out (row-pool source)
            pltpu.VMEM((B, FLAT), jnp.bfloat16),      # flatten scratch
        ],
        cost_estimate=pl.CostEstimate(flops=3_500_000, transcendentals=600,
                                      bytes_accessed=300_000),
    )(x2d, pk["wslab"], pk["bslab"])

    hash_code = out[:, :CODE_LENGTH]
    img_predict = out[:, CODE_LENGTH:CODE_LENGTH + LABEL_SIZE]
    return hash_code, img_predict


# =========================== parameter packing ==================================

def pack_params(p):
    """Repack canonical params into ONE bf16 weight slab + ONE f32 bias slab."""
    f32 = np.float32

    def conv_k_mat(w, w_sp, cin, cout):
        # Tap-fused banded weight: out_row = im2col_row @ M, K index = dy*(W*cin)+xi*cin+ci.
        m = np.zeros((3, w_sp * cin, w_sp * cout), f32)
        for dy in range(3):
            for dx in range(3):
                for wo in range(w_sp):
                    xi = wo + dx - 1
                    if 0 <= xi < w_sp:
                        m[dy, xi * cin:(xi + 1) * cin, wo * cout:(wo + 1) * cout] = w[dy, dx]
        return m.reshape(3 * w_sp * cin, w_sp * cout)

    def col_pool_mat(w_in, c):
        # (w_in*c, w_in*c) block: columns [:half] select even-w groups, [half:] odd-w.
        w_out = w_in // 2
        sel = np.zeros((w_in * c, w_in * c), f32)
        for wo in range(w_out):
            for cc in range(c):
                sel[(2 * wo) * c + cc, wo * c + cc] = 1.0
                sel[(2 * wo + 1) * c + cc, w_out * c + wo * c + cc] = 1.0
        return sel

    wslab = np.zeros((W_ROWS, LANES), f32)
    wslab[OFF_M1:OFF_M1 + K1, :N1] = conv_k_mat(np.asarray(p["conv1_w"], f32), HW, C_IN, C1)
    wslab[OFF_M2:OFF_M2 + K2, :N2] = conv_k_mat(np.asarray(p["conv2_w"], f32), H2, C1, C2)
    wslab[OFF_PC1:OFF_PC1 + N1, :N1] = col_pool_mat(HW, C1)
    wslab[OFF_PC2:OFF_PC2 + N2, :N2] = col_pool_mat(H2, C2)
    wslab[OFF_FC1:OFF_FC1 + FLAT, :HID] = np.asarray(p["fc1_w"], f32)
    wslab[OFF_FC2:OFF_FC2 + HID, :HID] = np.asarray(p["fc2_w"], f32)
    wslab[OFF_FEAT:OFF_FEAT + HID, :HID] = np.asarray(p["feat_w"], f32)
    wslab[OFF_CH:OFF_CH + HID, :CODE_LENGTH] = np.asarray(p["hash_w"], f32)
    wslab[OFF_CH:OFF_CH + HID, CODE_LENGTH:CODE_LENGTH + LABEL_SIZE] = np.asarray(p["cls_w"], f32)

    bslab = np.zeros((8, LANES), f32)
    bslab[0, :N1] = np.tile(np.asarray(p["conv1_b"], f32), HW)
    bslab[1, :N2] = np.tile(np.asarray(p["conv2_b"], f32), H2)
    bslab[2, :HID] = np.asarray(p["fc1_b"], f32)
    bslab[3, :HID] = np.asarray(p["fc2_b"], f32)
    bslab[4, :HID] = np.asarray(p["feat_b"], f32)
    bslab[5, :CODE_LENGTH] = np.asarray(p["hash_b"], f32)
    bslab[5, CODE_LENGTH:CODE_LENGTH + LABEL_SIZE] = np.asarray(p["cls_b"], f32)

    return dict(wslab=jnp.asarray(wslab, jnp.bfloat16), bslab=jnp.asarray(bslab))


# =========================== pure-XLA reference =================================

def reference_forward(x_nchw, p):
    """Independent (non-Pallas) reference with the same intended dataflow, f32."""
    hi = jax.lax.Precision.HIGHEST
    x = jnp.transpose(x_nchw, (0, 2, 3, 1)).astype(jnp.float32)

    def conv_relu(h, w, b):
        y = jax.lax.conv_general_dilated(
            h, w, window_strides=(1, 1), padding="SAME",
            dimension_numbers=("NHWC", "HWIO", "NHWC"), precision=hi)
        return jnp.maximum(y + b, 0.0)

    def maxpool2(h):
        return jax.lax.reduce_window(h, -jnp.inf, jax.lax.max,
                                     (1, 2, 2, 1), (1, 2, 2, 1), "VALID")

    h = maxpool2(conv_relu(x, p["conv1_w"], p["conv1_b"]))
    h = maxpool2(conv_relu(h, p["conv2_w"], p["conv2_b"]))
    h = h.reshape(h.shape[0], -1)                                  # NHWC flatten

    dot = lambda a, b: jnp.dot(a, b, precision=hi)
    h = jnp.maximum(dot(h, p["fc1_w"]) + p["fc1_b"], 0.0)
    h = jnp.maximum(dot(h, p["fc2_w"]) + p["fc2_b"], 0.0)
    feat = jnp.maximum(dot(h, p["feat_w"]) + p["feat_b"], 0.0)
    prob = jax.nn.softmax(dot(feat, p["cls_w"]) + p["cls_b"], axis=1)
    hash_code = jnp.tanh(dot(feat, p["hash_w"]) + p["hash_b"])
    return hash_code, prob


# =========================== parameter init =====================================

def init_params(key):
    ks = jax.random.split(key, 14)

    def w(k, shape, fan_in):
        return jax.random.normal(k, shape, jnp.float32) / float(np.sqrt(fan_in))

    def bias(k, n):
        return 0.01 * jax.random.normal(k, (n,), jnp.float32)

    return {
        "conv1_w": w(ks[0], (3, 3, C_IN, C1), 9 * C_IN), "conv1_b": bias(ks[1], C1),
        "conv2_w": w(ks[2], (3, 3, C1, C2), 9 * C1),     "conv2_b": bias(ks[3], C2),
        "fc1_w": w(ks[4], (FLAT, HID), FLAT),            "fc1_b": bias(ks[5], HID),
        "fc2_w": w(ks[6], (HID, HID), HID),              "fc2_b": bias(ks[7], HID),
        "feat_w": w(ks[8], (HID, HID), HID),             "feat_b": bias(ks[9], HID),
        "cls_w": w(ks[10], (HID, LABEL_SIZE), HID),      "cls_b": bias(ks[11], LABEL_SIZE),
        "hash_w": w(ks[12], (HID, CODE_LENGTH), HID),    "hash_b": bias(ks[13], CODE_LENGTH),
    }


# =========================== main ===============================================

if __name__ == "__main__":
    key = jax.random.PRNGKey(0)
    k_x, k_p = jax.random.split(key)

    x = jax.random.normal(k_x, (B, C_IN, HW, HW), jnp.float32)   # NCHW, like PyTorch
    params = init_params(k_p)
    packed = pack_params(params)

    fwd = jax.jit(imgnet_forward)
    hash_code, img_predict = fwd(x, packed)
    hash_code = jax.block_until_ready(hash_code)
    img_predict = jax.block_until_ready(img_predict)

    assert hash_code.shape == (B, CODE_LENGTH)
    assert img_predict.shape == (B, LABEL_SIZE)

    # sanity: softmax rows sum to 1 (exact divide), tanh outputs in [-1, 1]
    assert bool(jnp.all(jnp.abs(jnp.sum(img_predict, axis=1) - 1.0) < 1e-3))
    assert bool(jnp.all(jnp.abs(hash_code) <= 1.0 + 1e-6))

    # structural correctness vs an independent XLA reference (f32); tolerance covers
    # bf16 matmul operands in the kernel.
    ref_hash, ref_prob = reference_forward(x, params)
    assert bool(jnp.max(jnp.abs(hash_code - ref_hash)) < 7e-2), "hash_code mismatch vs reference"
    assert bool(jnp.max(jnp.abs(img_predict - ref_prob)) < 7e-2), "img_predict mismatch vs reference"

    print("KERNEL_OK")
</pallas_src>

<mosaic_0001>
module attributes {stable_mosaic.version = 11 : i64} {
  func.func @imgnet_fused_kernel(%arg0: memref<32x64xf32, #tpu.memory_space<vmem>>, %arg1: memref<992x128xbf16, #tpu.memory_space<vmem>>, %arg2: memref<8x128xf32, #tpu.memory_space<vmem>>, %arg3: memref<2x128xf32, #tpu.memory_space<vmem>>, %arg4: memref<32x192xbf16, #tpu.memory_space<vmem>>, %arg5: memref<32x128xf32, #tpu.memory_space<vmem>>, %arg6: memref<16x192xbf16, #tpu.memory_space<vmem>>, %arg7: memref<16x128xf32, #tpu.memory_space<vmem>>, %arg8: memref<2x256xbf16, #tpu.memory_space<vmem>>) attributes {dimension_semantics = [], scalar_prefetch = 0 : i64, scratch_operands = 5 : i64, tpu.core_type = #tpu.core_type<tc>} {
    %cst = arith.constant 0.000000e+00 : bf16
    %0 = vector.broadcast %cst : bf16 to vector<32x192xbf16>
    %c0 = arith.constant 0 : index
    %c0_0 = arith.constant 0 : index
    %1 = vector.load %arg4[%c0, %c0_0] : memref<32x192xbf16, #tpu.memory_space<vmem>>, vector<32x192xbf16>
    tpu.vector_store %arg4[%c0, %c0_0], %0 {strides = array<i32>} : memref<32x192xbf16, #tpu.memory_space<vmem>>, vector<32x192xbf16>,
    %cst_1 = arith.constant 0.000000e+00 : bf16
    %2 = vector.broadcast %cst_1 : bf16 to vector<16x192xbf16>
    %c0_2 = arith.constant 0 : index
    %c0_3 = arith.constant 0 : index
    %3 = vector.load %arg6[%c0_2, %c0_3] : memref<16x192xbf16, #tpu.memory_space<vmem>>, vector<16x192xbf16>
    tpu.vector_store %arg6[%c0_2, %c0_3], %2 {strides = array<i32>} : memref<16x192xbf16, #tpu.memory_space<vmem>>, vector<16x192xbf16>,
    %c0_4 = arith.constant 0 : index
    %c0_5 = arith.constant 0 : index
    %4 = vector.load %arg0[%c0_4, %c0_5] : memref<32x64xf32, #tpu.memory_space<vmem>>, vector<32x64xf32>
    %5 = arith.truncf %4 : vector<32x64xf32> to vector<32x64xbf16>
    %c0_6 = arith.constant 0 : index
    %c64 = arith.constant 64 : index
    %6 = vector.load %arg4[%c0_6, %c64] : memref<32x192xbf16, #tpu.memory_space<vmem>>, vector<32x64xbf16>
    tpu.vector_store %arg4[%c0_6, %c64], %5 {strides = array<i32>} : memref<32x192xbf16, #tpu.memory_space<vmem>>, vector<32x64xbf16>,
    %7 = vector.extract_strided_slice %5 {offsets = [0, 0], sizes = [31, 64], strides = [1, 1]} : vector<32x64xbf16> to vector<31x64xbf16>
    %c1 = arith.constant 1 : index
    %c0_7 = arith.constant 0 : index
    %8 = vector.load %arg4[%c1, %c0_7] : memref<32x192xbf16, #tpu.memory_space<vmem>>, vector<31x64xbf16>
    tpu.vector_store %arg4[%c1, %c0_7], %7 {strides = array<i32>} : memref<32x192xbf16, #tpu.memory_space<vmem>>, vector<31x64xbf16>,
    %cst_8 = arith.constant 0.000000e+00 : bf16
    %9 = vector.broadcast %cst_8 : bf16 to vector<1x64xbf16>
    %c16 = arith.constant 16 : index
    %c0_9 = arith.constant 0 : index
    %10 = vector.load %arg4[%c16, %c0_9] : memref<32x192xbf16, #tpu.memory_space<vmem>>, vector<1x64xbf16>
    tpu.vector_store %arg4[%c16, %c0_9], %9 {strides = array<i32>} : memref<32x192xbf16, #tpu.memory_space<vmem>>, vector<1x64xbf16>,
    %11 = vector.extract_strided_slice %5 {offsets = [1, 0], sizes = [31, 64], strides = [1, 1]} : vector<32x64xbf16> to vector<31x64xbf16>
    %c0_10 = arith.constant 0 : index
    %c128 = arith.constant 128 : index
    %12 = vector.load %arg4[%c0_10, %c128] : memref<32x192xbf16, #tpu.memory_space<vmem>>, vector<31x64xbf16>
    tpu.vector_store %arg4[%c0_10, %c128], %11 {strides = array<i32>} : memref<32x192xbf16, #tpu.memory_space<vmem>>, vector<31x64xbf16>,
    %cst_11 = arith.constant 0.000000e+00 : bf16
    %13 = vector.broadcast %cst_11 : bf16 to vector<1x64xbf16>
    %c15 = arith.constant 15 : index
    %c128_12 = arith.constant 128 : index
    %14 = vector.load %arg4[%c15, %c128_12] : memref<32x192xbf16, #tpu.memory_space<vmem>>, vector<1x64xbf16>
    tpu.vector_store %arg4[%c15, %c128_12], %13 {strides = array<i32>} : memref<32x192xbf16, #tpu.memory_space<vmem>>, vector<1x64xbf16>,
    %c0_13 = arith.constant 0 : index
    %c0_14 = arith.constant 0 : index
    %15 = vector.load %arg4[%c0_13, %c0_14] : memref<32x192xbf16, #tpu.memory_space<vmem>>, vector<32x192xbf16>
    %c0_15 = arith.constant 0 : index
    %c0_16 = arith.constant 0 : index
    %16 = vector.load %arg1[%c0_15, %c0_16] : memref<992x128xbf16, #tpu.memory_space<vmem>>, vector<192x128xbf16>
    %cst_17 = arith.constant dense<0.000000e+00> : vector<32x128xf32>
    %17 = tpu.matmul %15, %16, %cst_17 {dimension_numbers = #tpu.dot_dimension_numbers<[1], [0], [0], [1], [0, 0, 1, 1], [], []>} : vector<32x192xbf16>, vector<192x128xbf16>, vector<32x128xf32> -> vector<32x128xf32>
    %c0_18 = arith.constant 0 : index
    %c0_19 = arith.constant 0 : index
    %18 = vector.load %arg2[%c0_18, %c0_19] : memref<8x128xf32, #tpu.memory_space<vmem>>, vector<1x128xf32>
    %19 = vector.broadcast %18 : vector<1x128xf32> to vector<32x128xf32>
    %20 = arith.addf %17, %19 : vector<32x128xf32>
    %cst_20 = arith.constant 0.000000e+00 : f32
    %21 = vector.broadcast %cst_20 : f32 to vector<32x128xf32>
    %22 = arith.maximumf %20, %21 : vector<32x128xf32>
    %c0_21 = arith.constant 0 : index
    %c0_22 = arith.constant 0 : index
    %23 = vector.load %arg5[%c0_21, %c0_22] : memref<32x128xf32, #tpu.memory_space<vmem>>, vector<32x128xf32>
    tpu.vector_store %arg5[%c0_21, %c0_22], %22 {strides = array<i32>} : memref<32x128xf32, #tpu.memory_space<vmem>>, vector<32x128xf32>,
    %c0_23 = arith.constant 0 : index
    %c0_24 = arith.constant 0 : index
    %24 = tpu.strided_load %arg5[%c0_23, %c0_24] {strides = array<i32: 2, 1>} : memref<32x128xf32, #tpu.memory_space<vmem>>, vector<16x128xf32>
    %c1_25 = arith.constant 1 : index
    %c0_26 = arith.constant 0 : index
    %25 = tpu.strided_load %arg5[%c1_25, %c0_26] {strides = array<i32: 2, 1>} : memref<32x128xf32, #tpu.memory_space<vmem>>, vector<16x128xf32>
    %26 = arith.maximumf %24, %25 : vector<16x128xf32>
    %27 = arith.truncf %26 : vector<16x128xf32> to vector<16x128xbf16>
    %c384 = arith.constant 384 : index
    %c0_27 = arith.constant 0 : index
    %28 = vector.load %arg1[%c384, %c0_27] : memref<992x128xbf16, #tpu.memory_space<vmem>>, vector<128x128xbf16>
    %29 = vector.extract_strided_slice %28 {offsets = [0, 0], sizes = [128, 64], strides = [1, 1]} : vector<128x128xbf16> to vector<128x64xbf16>
    %cst_28 = arith.constant dense<0.000000e+00> : vector<16x64xf32>
    %30 = tpu.matmul %27, %29, %cst_28 {dimension_numbers = #tpu.dot_dimension_numbers<[1], [0], [0], [1], [0, 0, 1, 1], [], []>} : vector<16x128xbf16>, vector<128x64xbf16>, vector<16x64xf32> -> vector<16x64xf32>
    %31 = vector.extract_strided_slice %28 {offsets = [0, 64], sizes = [128, 64], strides = [1, 1]} : vector<128x128xbf16> to vector<128x64xbf16>
    %cst_29 = arith.constant dense<0.000000e+00> : vector<16x64xf32>
    %32 = tpu.matmul %27, %31, %cst_29 {dimension_numbers = #tpu.dot_dimension_numbers<[1], [0], [0], [1], [0, 0, 1, 1], [], []>} : vector<16x128xbf16>, vector<128x64xbf16>, vector<16x64xf32> -> vector<16x64xf32>
    %33 = arith.maximumf %30, %32 : vector<16x64xf32>
    %34 = arith.truncf %33 : vector<16x64xf32> to vector<16x64xbf16>
    %c0_30 = arith.constant 0 : index
    %c64_31 = arith.constant 64 : index
    %35 = vector.load %arg6[%c0_30, %c64_31] : memref<16x192xbf16, #tpu.memory_space<vmem>>, vector<16x64xbf16>
    tpu.vector_store %arg6[%c0_30, %c64_31], %34 {strides = array<i32>} : memref<16x192xbf16, #tpu.memory_space<vmem>>, vector<16x64xbf16>,
    %36 = vector.extract_strided_slice %34 {offsets = [0, 0], sizes = [15, 64], strides = [1, 1]} : vector<16x64xbf16> to vector<15x64xbf16>
    %c1_32 = arith.constant 1 : index
    %c0_33 = arith.constant 0 : index
    %37 = vector.load %arg6[%c1_32, %c0_33] : memref<16x192xbf16, #tpu.memory_space<vmem>>, vector<15x64xbf16>
    tpu.vector_store %arg6[%c1_32, %c0_33], %36 {strides = array<i32>} : memref<16x192xbf16, #tpu.memory_space<vmem>>, vector<15x64xbf16>,
    %cst_34 = arith.constant 0.000000e+00 : bf16
    %38 = vector.broadcast %cst_34 : bf16 to vector<1x64xbf16>
    %c8 = arith.constant 8 : index
    %c0_35 = arith.constant 0 : index
    %39 = vector.load %arg6[%c8, %c0_35] : memref<16x192xbf16, #tpu.memory_space<vmem>>, vector<1x64xbf16>
    tpu.vector_store %arg6[%c8, %c0_35], %38 {strides = array<i32>} : memref<16x192xbf16, #tpu.memory_space<vmem>>, vector<1x64xbf16>,
    %40 = vector.extract_strided_slice %34 {offsets = [1, 0], sizes = [15, 64], strides = [1, 1]} : vector<16x64xbf16> to vector<15x64xbf16>
    %c0_36 = arith.constant 0 : index
    %c128_37 = arith.constant 128 : index
    %41 = vector.load %arg6[%c0_36, %c128_37] : memref<16x192xbf16, #tpu.memory_space<vmem>>, vector<15x64xbf16>
    tpu.vector_store %arg6[%c0_36, %c128_37], %40 {strides = array<i32>} : memref<16x192xbf16, #tpu.memory_space<vmem>>, vector<15x64xbf16>,
    %cst_38 = arith.constant 0.000000e+00 : bf16
    %42 = vector.broadcast %cst_38 : bf16 to vector<1x64xbf16>
    %c7 = arith.constant 7 : index
    %c128_39 = arith.constant 128 : index
    %43 = vector.load %arg6[%c7, %c128_39] : memref<16x192xbf16, #tpu.memory_space<vmem>>, vector<1x64xbf16>
    tpu.vector_store %arg6[%c7, %c128_39], %42 {strides = array<i32>} : memref<16x192xbf16, #tpu.memory_space<vmem>>, vector<1x64xbf16>,
    %c0_40 = arith.constant 0 : index
    %c0_41 = arith.constant 0 : index
    %44 = vector.load %arg6[%c0_40, %c0_41] : memref<16x192xbf16, #tpu.memory_space<vmem>>, vector<16x192xbf16>
    %c192 = arith.constant 192 : index
    %c0_42 = arith.constant 0 : index
    %45 = vector.load %arg1[%c192, %c0_42] : memref<992x128xbf16, #tpu.memory_space<vmem>>, vector<192x128xbf16>
    %cst_43 = arith.constant dense<0.000000e+00> : vector<16x128xf32>
    %46 = tpu.matmul %44, %45, %cst_43 {dimension_numbers = #tpu.dot_dimension_numbers<[1], [0], [0], [1], [0, 0, 1, 1], [], []>} : vector<16x192xbf16>, vector<192x128xbf16>, vector<16x128xf32> -> vector<16x128xf32>
    %c1_44 = arith.constant 1 : index
    %c0_45 = arith.constant 0 : index
    %47 = vector.load %arg2[%c1_44, %c0_45] : memref<8x128xf32, #tpu.memory_space<vmem>>, vector<1x128xf32>
    %48 = vector.broadcast %47 : vector<1x128xf32> to vector<16x128xf32>
    %49 = arith.addf %46, %48 : vector<16x128xf32>
    %cst_46 = arith.constant 0.000000e+00 : f32
    %50 = vector.broadcast %cst_46 : f32 to vector<16x128xf32>
    %51 = arith.maximumf %49, %50 : vector<16x128xf32>
    %c0_47 = arith.constant 0 : index
    %c0_48 = arith.constant 0 : index
    %52 = vector.load %arg7[%c0_47, %c0_48] : memref<16x128xf32, #tpu.memory_space<vmem>>, vector<16x128xf32>
    tpu.vector_store %arg7[%c0_47, %c0_48], %51 {strides = array<i32>} : memref<16x128xf32, #tpu.memory_space<vmem>>, vector<16x128xf32>,
    %c0_49 = arith.constant 0 : index
    %c0_50 = arith.constant 0 : index
    %53 = tpu.strided_load %arg7[%c0_49, %c0_50] {strides = array<i32: 2, 1>} : memref<16x128xf32, #tpu.memory_space<vmem>>, vector<8x128xf32>
    %c1_51 = arith.constant 1 : index
    %c0_52 = arith.constant 0 : index
    %54 = tpu.strided_load %arg7[%c1_51, %c0_52] {strides = array<i32: 2, 1>} : memref<16x128xf32, #tpu.memory_space<vmem>>, vector<8x128xf32>
    %55 = arith.maximumf %53, %54 : vector<8x128xf32>
    %56 = arith.truncf %55 : vector<8x128xf32> to vector<8x128xbf16>
    %c512 = arith.constant 512 : index
    %c0_53 = arith.constant 0 : index
    %57 = vector.load %arg1[%c512, %c0_53] : memref<992x128xbf16, #tpu.memory_space<vmem>>, vector<128x128xbf16>
    %58 = vector.extract_strided_slice %57 {offsets = [0, 0], sizes = [128, 64], strides = [1, 1]} : vector<128x128xbf16> to vector<128x64xbf16>
    %cst_54 = arith.constant dense<0.000000e+00> : vector<8x64xf32>
    %59 = tpu.matmul %56, %58, %cst_54 {dimension_numbers = #tpu.dot_dimension_numbers<[1], [0], [0], [1], [0, 0, 1, 1], [], []>} : vector<8x128xbf16>, vector<128x64xbf16>, vector<8x64xf32> -> vector<8x64xf32>
    %60 = vector.extract_strided_slice %57 {offsets = [0, 64], sizes = [128, 64], strides = [1, 1]} : vector<128x128xbf16> to vector<128x64xbf16>
    %cst_55 = arith.constant dense<0.000000e+00> : vector<8x64xf32>
    %61 = tpu.matmul %56, %60, %cst_55 {dimension_numbers = #tpu.dot_dimension_numbers<[1], [0], [0], [1], [0, 0, 1, 1], [], []>} : vector<8x128xbf16>, vector<128x64xbf16>, vector<8x64xf32> -> vector<8x64xf32>
    %62 = arith.maximumf %59, %61 : vector<8x64xf32>
    %63 = arith.truncf %62 : vector<8x64xf32> to vector<8x64xbf16>
    %64 = vector.extract_strided_slice %63 {offsets = [0, 0], sizes = [1, 64], strides = [1, 1]} : vector<8x64xbf16> to vector<1x64xbf16>
    %c0_56 = arith.constant 0 : index
    %c0_57 = arith.constant 0 : index
    %65 = vector.load %arg8[%c0_56, %c0_57] : memref<2x256xbf16, #tpu.memory_space<vmem>>, vector<1x64xbf16>
    tpu.vector_store %arg8[%c0_56, %c0_57], %64 {strides = array<i32>} : memref<2x256xbf16, #tpu.memory_space<vmem>>, vector<1x64xbf16>,
    %66 = vector.extract_strided_slice %63 {offsets = [1, 0], sizes = [1, 64], strides = [1, 1]} : vector<8x64xbf16> to vector<1x64xbf16>
    %c0_58 = arith.constant 0 : index
    %c64_59 = arith.constant 64 : index
    %67 = vector.load %arg8[%c0_58, %c64_59] : memref<2x256xbf16, #tpu.memory_space<vmem>>, vector<1x64xbf16>
    tpu.vector_store %arg8[%c0_58, %c64_59], %66 {strides = array<i32>} : memref<2x256xbf16, #tpu.memory_space<vmem>>, vector<1x64xbf16>,
    %68 = vector.extract_strided_slice %63 {offsets = [2, 0], sizes = [1, 64], strides = [1, 1]} : vector<8x64xbf16> to vector<1x64xbf16>
    %c0_60 = arith.constant 0 : index
    %c128_61 = arith.constant 128 : index
    %69 = vector.load %arg8[%c0_60, %c128_61] : memref<2x256xbf16, #tpu.memory_space<vmem>>, vector<1x64xbf16>
    tpu.vector_store %arg8[%c0_60, %c128_61], %68 {strides = array<i32>} : memref<2x256xbf16, #tpu.memory_space<vmem>>, vector<1x64xbf16>,
    %70 = vector.extract_strided_slice %63 {offsets = [3, 0], sizes = [1, 64], strides = [1, 1]} : vector<8x64xbf16> to vector<1x64xbf16>
    %c0_62 = arith.constant 0 : index
    %c192_63 = arith.constant 192 : index
    %71 = vector.load %arg8[%c0_62, %c192_63] : memref<2x256xbf16, #tpu.memory_space<vmem>>, vector<1x64xbf16>
    tpu.vector_store %arg8[%c0_62, %c192_63], %70 {strides = array<i32>} : memref<2x256xbf16, #tpu.memory_space<vmem>>, vector<1x64xbf16>,
    %72 = vector.extract_strided_slice %63 {offsets = [4, 0], sizes = [1, 64], strides = [1, 1]} : vector<8x64xbf16> to vector<1x64xbf16>
    %c1_64 = arith.constant 1 : index
    %c0_65 = arith.constant 0 : index
    %73 = vector.load %arg8[%c1_64, %c0_65] : memref<2x256xbf16, #tpu.memory_space<vmem>>, vector<1x64xbf16>
    tpu.vector_store %arg8[%c1_64, %c0_65], %72 {strides = array<i32>} : memref<2x256xbf16, #tpu.memory_space<vmem>>, vector<1x64xbf16>,
    %74 = vector.extract_strided_slice %63 {offsets = [5, 0], sizes = [1, 64], strides = [1, 1]} : vector<8x64xbf16> to vector<1x64xbf16>
    %c1_66 = arith.constant 1 : index
    %c64_67 = arith.constant 64 : index
    %75 = vector.load %arg8[%c1_66, %c64_67] : memref<2x256xbf16, #tpu.memory_space<vmem>>, vector<1x64xbf16>
    tpu.vector_store %arg8[%c1_66, %c64_67], %74 {strides = array<i32>} : memref<2x256xbf16, #tpu.memory_space<vmem>>, vector<1x64xbf16>,
    %76 = vector.extract_strided_slice %63 {offsets = [6, 0], sizes = [1, 64], strides = [1, 1]} : vector<8x64xbf16> to vector<1x64xbf16>
    %c1_68 = arith.constant 1 : index
    %c128_69 = arith.constant 128 : index
    %77 = vector.load %arg8[%c1_68, %c128_69] : memref<2x256xbf16, #tpu.memory_space<vmem>>, vector<1x64xbf16>
    tpu.vector_store %arg8[%c1_68, %c128_69], %76 {strides = array<i32>} : memref<2x256xbf16, #tpu.memory_space<vmem>>, vector<1x64xbf16>,
    %78 = vector.extract_strided_slice %63 {offsets = [7, 0], sizes = [1, 64], strides = [1, 1]} : vector<8x64xbf16> to vector<1x64xbf16>
    %c1_70 = arith.constant 1 : index
    %c192_71 = arith.constant 192 : index
    %79 = vector.load %arg8[%c1_70, %c192_71] : memref<2x256xbf16, #tpu.memory_space<vmem>>, vector<1x64xbf16>
    tpu.vector_store %arg8[%c1_70, %c192_71], %78 {strides = array<i32>} : memref<2x256xbf16, #tpu.memory_space<vmem>>, vector<1x64xbf16>,
    %c0_72 = arith.constant 0 : index
    %c0_73 = arith.constant 0 : index
    %80 = vector.load %arg8[%c0_72, %c0_73] : memref<2x256xbf16, #tpu.memory_space<vmem>>, vector<2x256xbf16>
    %c640 = arith.constant 640 : index
    %c0_74 = arith.constant 0 : index
    %81 = vector.load %arg1[%c640, %c0_74] : memref<992x128xbf16, #tpu.memory_space<vmem>>, vector<256x32xbf16>
    %cst_75 = arith.constant dense<0.000000e+00> : vector<2x32xf32>
    %82 = tpu.matmul %80, %81, %cst_75 {dimension_numbers = #tpu.dot_dimension_numbers<[1], [0], [0], [1], [0, 0, 1, 1], [], []>} : vector<2x256xbf16>, vector<256x32xbf16>, vector<2x32xf32> -> vector<2x32xf32>
    %c2 = arith.constant 2 : index
    %c0_76 = arith.constant 0 : index
    %83 = vector.load %arg2[%c2, %c0_76] : memref<8x128xf32, #tpu.memory_space<vmem>>, vector<1x32xf32>
    %84 = vector.broadcast %83 : vector<1x32xf32> to vector<2x32xf32>
    %85 = arith.addf %82, %84 : vector<2x32xf32>
    %cst_77 = arith.constant 0.000000e+00 : f32
    %86 = vector.broadcast %cst_77 : f32 to vector<2x32xf32>
    %87 = arith.maximumf %85, %86 : vector<2x32xf32>
    %88 = arith.truncf %87 : vector<2x32xf32> to vector<2x32xbf16>
    %c896 = arith.constant 896 : index
    %c0_78 = arith.constant 0 : index
    %89 = vector.load %arg1[%c896, %c0_78] : memref<992x128xbf16, #tpu.memory_space<vmem>>, vector<32x32xbf16>
    %cst_79 = arith.constant dense<0.000000e+00> : vector<2x32xf32>
    %90 = tpu.matmul %88, %89, %cst_79 {dimension_numbers = #tpu.dot_dimension_numbers<[1], [0], [0], [1], [0, 0, 1, 1], [], []>} : vector<2x32xbf16>, vector<32x32xbf16>, vector<2x32xf32> -> vector<2x32xf32>
    %c3 = arith.constant 3 : index
    %c0_80 = arith.constant 0 : index
    %91 = vector.load %arg2[%c3, %c0_80] : memref<8x128xf32, #tpu.memory_space<vmem>>, vector<1x32xf32>
    %92 = vector.broadcast %91 : vector<1x32xf32> to vector<2x32xf32>
    %93 = arith.addf %90, %92 : vector<2x32xf32>
    %cst_81 = arith.constant 0.000000e+00 : f32
    %94 = vector.broadcast %cst_81 : f32 to vector<2x32xf32>
    %95 = arith.maximumf %93, %94 : vector<2x32xf32>
    %96 = arith.truncf %95 : vector<2x32xf32> to vector<2x32xbf16>
    %c928 = arith.constant 928 : index
    %c0_82 = arith.constant 0 : index
    %97 = vector.load %arg1[%c928, %c0_82] : memref<992x128xbf16, #tpu.memory_space<vmem>>, vector<32x32xbf16>
    %cst_83 = arith.constant dense<0.000000e+00> : vector<2x32xf32>
    %98 = tpu.matmul %96, %97, %cst_83 {dimension_numbers = #tpu.dot_dimension_numbers<[1], [0], [0], [1], [0, 0, 1, 1], [], []>} : vector<2x32xbf16>, vector<32x32xbf16>, vector<2x32xf32> -> vector<2x32xf32>
    %c4 = arith.constant 4 : index
    %c0_84 = arith.constant 0 : index
    %99 = vector.load %arg2[%c4, %c0_84] : memref<8x128xf32, #tpu.memory_space<vmem>>, vector<1x32xf32>
    %100 = vector.broadcast %99 : vector<1x32xf32> to vector<2x32xf32>
    %101 = arith.addf %98, %100 : vector<2x32xf32>
    %cst_85 = arith.constant 0.000000e+00 : f32
    %102 = vector.broadcast %cst_85 : f32 to vector<2x32xf32>
    %103 = arith.maximumf %101, %102 : vector<2x32xf32>
    %104 = arith.truncf %103 : vector<2x32xf32> to vector<2x32xbf16>
    %c960 = arith.constant 960 : index
    %c0_86 = arith.constant 0 : index
    %105 = vector.load %arg1[%c960, %c0_86] : memref<992x128xbf16, #tpu.memory_space<vmem>>, vector<32x128xbf16>
    %cst_87 = arith.constant dense<0.000000e+00> : vector<2x128xf32>
    %106 = tpu.matmul %104, %105, %cst_87 {dimension_numbers = #tpu.dot_dimension_numbers<[1], [0], [0], [1], [0, 0, 1, 1], [], []>} : vector<2x32xbf16>, vector<32x128xbf16>, vector<2x128xf32> -> vector<2x128xf32>
    %c5 = arith.constant 5 : index
    %c0_88 = arith.constant 0 : index
    %107 = vector.load %arg2[%c5, %c0_88] : memref<8x128xf32, #tpu.memory_space<vmem>>, vector<1x128xf32>
    %108 = vector.broadcast %107 : vector<1x128xf32> to vector<2x128xf32>
    %109 = arith.addf %106, %108 : vector<2x128xf32>
    %110 = tpu.iota {dimensions = array<i32: 1>} : vector<2x128xi32>
    %c16_i32 = arith.constant 16 : i32
    %111 = vector.broadcast %c16_i32 : i32 to vector<2x128xi32>
    %112 = arith.cmpi sge, %110, %111 : vector<2x128xi32>
    %c26_i32 = arith.constant 26 : i32
    %113 = vector.broadcast %c26_i32 : i32 to vector<2x128xi32>
    %114 = arith.cmpi slt, %110, %113 : vector<2x128xi32>
    %115 = arith.andi %112, %114 : vector<2x128xi1>
    %cst_89 = arith.constant 0xFF800000 : f32
    %116 = vector.broadcast %cst_89 : f32 to vector<2x128xf32>
    %117 = arith.select %115, %109, %116 : vector<2x128xi1>, vector<2x128xf32>
    %cst_90 = arith.constant dense<0xFF800000> : vector<2xf32>
    %118 = vector.multi_reduction <maximumf>, %117, %cst_90 [1] : vector<2x128xf32> to vector<2xf32>
    %119 = vector.shape_cast %118 : vector<2xf32> to vector<2x1xf32>
    %120 = vector.broadcast %119 : vector<2x1xf32> to vector<2x128xf32>
    %121 = arith.subf %117, %120 : vector<2x128xf32>
    %122 = math.exp %121 : vector<2x128xf32>
    %cst_91 = arith.constant dense<0.000000e+00> : vector<2xf32>
    %123 = vector.multi_reduction <add>, %122, %cst_91 [1] : vector<2x128xf32> to vector<2xf32>
    %124 = vector.shape_cast %123 : vector<2xf32> to vector<2x1xf32>
    %125 = vector.broadcast %124 : vector<2x1xf32> to vector<2x128xf32>
    %126 = arith.divf %122, %125 : vector<2x128xf32>
    %c16_i32_92 = arith.constant 16 : i32
    %127 = vector.broadcast %c16_i32_92 : i32 to vector<2x128xi32>
    %128 = arith.cmpi slt, %110, %127 : vector<2x128xi32>
    %129 = math.tanh %109 : vector<2x128xf32>
    %130 = arith.select %128, %129, %126 : vector<2x128xi1>, vector<2x128xf32>
    %c0_93 = arith.constant 0 : index
    %c0_94 = arith.constant 0 : index
    %131 = vector.load %arg3[%c0_93, %c0_94] : memref<2x128xf32, #tpu.memory_space<vmem>>, vector<2x128xf32>
    tpu.vector_store %arg3[%c0_93, %c0_94], %130 {strides = array<i32>} : memref<2x128xf32, #tpu.memory_space<vmem>>, vector<2x128xf32>,
    return
  }
}

</mosaic_0001>

<bundles_post_ra>
// kernel: imgnet_forward.1
= control target key start
LH: loop header
LB: loop body
LE: loop exit
PB: predicated region body
PF: predicated region fallthrough
CT: control target
= control target key end

     0   :  { %vm16_vm0 = vcmask 523264   ;;  %v1628_v2 = vmov 0   ;;  %vm69_vm1 = vsmask.f32 7424  ;;  %s1629_s22 = smov 64   ;;  %vm82_vm4 = vcmask 523271   ;;  %s2050_s0 = inlined_call_operand.vmem [shape: f32[32,64], index: 0, kind: input, shape index: {}]   ;;  %s2051_s1 = inlined_call_operand.vmem [shape: bf16[992,128], index: 1, kind: input, shape index: {}]   ;;  %s2052_s2 = inlined_call_operand.vmem [shape: f32[8,128], index: 2, kind: input, shape index: {}]   ;;  %s2053_s3 = inlined_call_operand.vmem [shape: f32[2,128], index: 3, kind: output, shape index: {}]  }
   0x1   :  { %v22_v0 = vld [vmem:[%s2050_s0] sm:$0xff]  ;;  %v23_v1 = vld [vmem:[%s2050_s0 + $0x8] sm:$0xff]  ;;  %17 = vst.msk [vmem:[#allocation2 + $0x8] sm:$0xff] %vm16_vm0, %v1628_v2  ;;  %19 = vst.msk [vmem:[#allocation2 + $0x18] sm:$0xff] %vm16_vm0, %v1628_v2  ;;  %199 = vmatprep.subr.bf16.mxu0 %v1628_v2  ;;  %vm39_vm3 = vsmask.f32 256 }
   0x2   :  { %v24_v3 = vld [vmem:[%s2050_s0 + $0x10] sm:$0xff]  ;;  %15 = vst [vmem:[#allocation2] sm:$0xff] %v1628_v2  ;;  %18 = vst [vmem:[#allocation2 + $0x10] sm:$0xff] %v1628_v2  ;;  %v26_v4 = vpack.c.bf16 %v23_v1, %v22_v0  ;;  %v25_v5 = vld [vmem:[%s2050_s0 + $0x18] sm:$0xff]  ;;  %vm83_vm5 = vsmask.f32 7966 }
   0x3   :  { %20 = vst [vmem:[#allocation4] sm:$0xff] %v1628_v2  ;;  %21 = vst.msk [vmem:[#allocation4 + $0x8] sm:$0xff] %vm16_vm0, %v1628_v2  ;;  %v27_v6 = vpack.c.bf16 %v25_v5, %v24_v3  ;;  %v1560_v7 = vld [vmem:[%s2051_s1] sm:$0xff]   ;;  %v1561_v12 = vld [vmem:[%s2051_s1 + $0x8] sm:$0xff]   ;;  %v1630_v28 = vmov 0.0   ;;  %vm36_vm7 = vcmask 1048064  }
   0x4   :  { %30 = vrot.lane.b32.xlu0 %v26_v4, %s1629_s22  ;;  %v41_v8 = vshrl.u32 %v26_v4, 16  ;;  %v44_v9 = vshll.u32 %v26_v4, 16  ;;  %200 = vmatpush1.bf16.msra.mxu0 %v1560_v7  ;;  %vm1685_vm2 = vmand %vm16_vm0, %vm69_vm1  ;;  %v1562_v23 = vld [vmem:[%s2051_s1 + $0x10] sm:$0xff]   ;;  %v1563_v27 = vld [vmem:[%s2051_s1 + $0x18] sm:$0xff]   ;;  %vm58_vm8 = vsmask.f32 7938 }
   0x5   :  { %v48_v10 = vshrl.u32 %v27_v6, 16  ;;  %v51_v11 = vshll.u32 %v27_v6, 16  ;;  %201 = vmatprep.subr.bf16.mxu0 %v1628_v2  ;;  %1451 = vmatprep.subr.bf16.mxu1 %v1630_v28  ;;  %vm84_vm6 = vmand %vm82_vm4, %vm83_vm5  ;;  %v1564_v29 = vld [vmem:[%s2051_s1 + $0x20] sm:$0xff]   ;;  %v1573_v32 = vld [vmem:[%s2051_s1 + $0xc8] sm:$0xff]   ;;  %vm64_vm10 = vcmask 516096   ;;  %vm1631_vm12 = vmmov 0  }
   0x6   :  { %v43_v13 = vrot.slane %v41_v8, 7  ;;  %v70_v14 = vrot.slane %v44_v9, 1  ;;  %v1572_v30 = vld [vmem:[%s2051_s1 + $0xc0] sm:$0xff]   ;;  %v1574_v34 = vld [vmem:[%s2051_s1 + $0xd0] sm:$0xff]   ;;  %v1565_v35 = vld [vmem:[%s2051_s1 + $0x28] sm:$0xff]   ;;  %1467 = vmatprep.mubr.msk.bf16.mxu1 %vm1631_vm12, %v1630_v28  ;;  %vm467_vm13 = vcmask 519171  }
   0x7   :  { %v50_v15 = vrot.slane %v48_v10, 7  ;;  %v72_v16 = vrot.slane %v51_v11, 1  ;;  %371 = vrot.lane.b32.xlu1 %v1572_v30, %s1629_s22  ;;  %1452 = vmatpush3.bf16.msra.mxu1 %v1572_v30  ;;  %v1576_v36 = vld [vmem:[%s2051_s1 + $0xe0] sm:$0xff]   ;;  %v1575_v37 = vld [vmem:[%s2051_s1 + $0xd8] sm:$0xff]   ;;  %v1566_v38 = vld [vmem:[%s2051_s1 + $0x30] sm:$0xff]   ;;  %vm825_vm4 = vcmask 1040896  }
   0x8   :  { %v1689_v18 = vor.u32 %v44_v9, %v43_v13  ;;  %v71_v19 = vor.u32 %v70_v14, %v41_v8  ;;  %v79_v20 = vld [vmem:[#allocation2 + $0x18] sm:$0xff]  ;;  %32 = vrot.lane.b32.xlu0 %v27_v6, %s1629_s22  ;;  %202 = vmatpush1.bf16.msra.mxu0 %v1561_v12  ;;  %v1578_v39 = vld [vmem:[%s2051_s1 + $0xf0] sm:$0xff]   ;;  %v1577_v40 = vld [vmem:[%s2051_s1 + $0xe8] sm:$0xff]   ;;  %vm468_vm14 = vsmask.f32 7950 }
   0x9   :  { %v53_v21 = vor.u32 %v51_v11, %v50_v15  ;;  %v74_v22 = vor.u32 %v72_v16, %v48_v10  ;;  %203 = vmatprep.subr.bf16.mxu0 %v1628_v2  ;;  %1453 = vmatprep.subr.bf16.mxu1 %v1630_v28  ;;  %v1567_v41 = vld [vmem:[%s2051_s1 + $0x38] sm:$0xff]   ;;  %v1568_v44 = vld [vmem:[%s2051_s1 + $0x40] sm:$0xff]   ;;  %v1569_v45 = vld [vmem:[%s2051_s1 + $0x48] sm:$0xff]  }
   0xa   :  { %v73_v24 = vsel %vm69_vm1, %v71_v19, %v72_v16  ;;  %v1579_v43 = vld [vmem:[%s2051_s1 + $0xf8] sm:$0xff]   ;;  %v1570_v46 = vld [vmem:[%s2051_s1 + $0x50] sm:$0xff]   ;;  %vm1789_vm9 = vmand %vm16_vm0, %vm58_vm8  ;;  %vm456_vm1 = vsmask.f32 4352 }
   0xb   :  { %v1699_v25 = vsel %vm1685_vm2, %v74_v22, %v79_v20  ;;  %77 = vst.msk [vmem:[#allocation2 + $0x8] sm:$0xff] %vm16_vm0, %v73_v24  ;;  %v1703_v26 = vsel %vm39_vm3, %v43_v13, %v53_v21  ;;  %373 = vrot.lane.b32.xlu1 %v1573_v32, %s1629_s22  ;;  %1454 = vmatpush3.bf16.msra.mxu1 %v1573_v32  ;;  %v1571_v47 = vld [vmem:[%s2051_s1 + $0x58] sm:$0xff]   ;;  %vm1800_vm11 = vmand %vm64_vm10, %vm39_vm3  ;;  %v1307_v57 = vld [vmem:[%s2052_s2] ss:$0 sm:$0xff] }
   0xc   :  { %81 = vst [vmem:[#allocation2 + $0x18] sm:$0xff] %v1699_v25  ;;  %204 = vmatpush1.bf16.msra.mxu0 %v1562_v23  ;;  %375 = vrot.lane.b32.xlu0 %v1574_v34, %s1629_s22  ;;  %v1582_v30 = vld [vmem:[%s2051_s1 + $0x70] sm:$0xff]   ;;  %v1584_v32 = vld [vmem:[%s2051_s1 + $0x80] sm:$0xff]   ;;  %vm469_vm15 = vmand %vm467_vm13, %vm468_vm14 }
   0xd   :  { %205 = vmatprep.subr.bf16.mxu0 %v1628_v2  ;;  %1455 = vmatprep.subr.bf16.mxu1 %v1630_v28  ;;  %v1593_v17 = vld [vmem:[%s2051_s1 + $0x108] sm:$0xff]   ;;  %v1609_v53 = vld [vmem:[%s2051_s1 + $0x160] sm:$0xff]   ;;  %vm826_vm5 = vmand %vm825_vm4, %vm39_vm3 }
   0xe   :  { %vm865_vm3 = vmand %vm825_vm4, %vm58_vm8 }
   0xf   :  { %377 = vrot.lane.b32.xlu1 %v1575_v37, %s1629_s22  ;;  %1456 = vmatpush3.bf16.msra.mxu1 %v1574_v34 }
  0x10   :  { %206 = vmatpush1.bf16.msra.mxu0 %v1563_v27  ;;  %379 = vrot.lane.b32.xlu0 %v1576_v36, %s1629_s22  ;;  %v1580_v27 = vld [vmem:[%s2051_s1 + $0x60] sm:$0xff]  }
  0x11   :  { %207 = vmatprep.subr.bf16.mxu0 %v1628_v2  ;;  %1457 = vmatprep.subr.bf16.mxu1 %v1630_v28 }
  0x12   :  { %v85_v31 = vld [vmem:[#allocation2 + $0x8] sm:$0x80] }
  0x13   :  { %v86_v33 = vsel %vm84_vm6, 0, %v85_v31  ;;  %381 = vrot.lane.b32.xlu1 %v1577_v40, %s1629_s22  ;;  %1458 = vmatpush3.bf16.msra.mxu1 %v1575_v37  ;;  %v1583_v31 = vld [vmem:[%s2051_s1 + $0x78] sm:$0xff]   ;;  %vm858_vm6 = vmand %vm64_vm10, %vm58_vm8 }
  0x14   :  { %87 = vst [vmem:[#allocation2 + $0x8] sm:$0x80] %v86_v33  ;;  %208 = vmatpush1.bf16.msra.mxu0 %v1564_v29  ;;  %383 = vrot.lane.b32.xlu0 %v1578_v39, %s1629_s22  ;;  %v1581_v29 = vld [vmem:[%s2051_s1 + $0x68] sm:$0xff]  }
  0x15   :  { %209 = vmatprep.subr.bf16.mxu0 %v1628_v2  ;;  %1459 = vmatprep.subr.bf16.mxu1 %v1630_v28  ;;  %v1585_v33 = vld [vmem:[%s2051_s1 + $0x88] sm:$0xff]  }
  0x17   :  { %385 = vrot.lane.b32.xlu1 %v1579_v43, %s1629_s22  ;;  %1460 = vmatpush3.bf16.msra.mxu1 %v1576_v36 }
  0x18   :  { %210 = vmatpush1.bf16.msra.mxu0 %v1565_v35  ;;  %1461 = vmatprep.subr.bf16.mxu1 %v1630_v28 }
  0x19   :  { %211 = vmatprep.subr.bf16.mxu0 %v1628_v2 }
  0x1b   :  { %v89_v42 = vld [vmem:[#allocation2 + $0x8] sm:$0xff]  ;;  %1462 = vmatpush3.bf16.msra.mxu1 %v1577_v40 }
  0x1c   :  { %1320 = vmatprep.mubr.msk.bf16.mxu0 %vm16_vm0, %v89_v42  ;;  %212 = vmatpush1.bf16.msra.mxu0 %v1566_v38  ;;  %v1586_v38 = vld [vmem:[%s2051_s1 + $0x90] sm:$0xff]  }
  0x1d   :  { %213 = vmatprep.subr.bf16.mxu0 %v1628_v2  ;;  %1463 = vmatprep.subr.bf16.mxu1 %v1630_v28 }
  0x1f   :  { %1464 = vmatpush3.bf16.msra.mxu1 %v1578_v39  ;;  %v1587_v39 = vld [vmem:[%s2051_s1 + $0x98] sm:$0xff]  }
  0x20   :  { %214 = vmatpush1.bf16.msra.mxu0 %v1567_v41  ;;  %1465 = vmatprep.subr.bf16.mxu1 %v1630_v28 }
  0x21   :  { %215 = vmatprep.subr.bf16.mxu0 %v1628_v2 }
  0x23   :  { %1466 = vmatpush3.bf16.msra.mxu1 %v1579_v43 }
  0x24   :  { %216 = vmatpush1.bf16.msra.mxu0 %v1568_v44  ;;  %1471 = vmatprep.subr.bf16.mxu1 %v1630_v28 }
  0x25   :  { %217 = vmatprep.subr.bf16.mxu0 %v1628_v2 }
  0x28   :  { %218 = vmatpush1.bf16.msra.mxu0 %v1569_v45 }
  0x29   :  { %219 = vmatprep.subr.bf16.mxu0 %v1628_v2 }
  0x2c   :  { %220 = vmatpush1.bf16.msra.mxu0 %v1570_v46  ;;  %v1588_v46 = vld [vmem:[%s2051_s1 + $0xa0] sm:$0xff]  }
  0x2d   :  { %221 = vmatprep.subr.bf16.mxu0 %v1628_v2 }
  0x30   :  { %222 = vmatpush1.bf16.msra.mxu0 %v1571_v47 }
  0x31   :  { %579 = vmatprep.subr.bf16.mxu0 %v1628_v2 }
  0x76   :  { %v31_v48 = vpop.permute.xlu0 %30 }
  0x77   :  { %37 = vst.msk [vmem:[#allocation2] sm:$0xff] %vm36_vm7, %v31_v48 }
  0x79   :  { %v372_v15 = vpop.permute.xlu1 %371 }
  0x7a   :  { %v33_v49 = vpop.permute.xlu0 %32 }
  0x7b   :  { %38 = vst.msk [vmem:[#allocation2 + $0x10] sm:$0xff] %vm36_vm7, %v33_v49 }
  0x7c   :  { %63 = vst.msk [vmem:[#allocation2 + $0x10] sm:$0xff] %vm16_vm0, %v1703_v26 }
  0x7d   :  { %v374_v20 = vpop.permute.xlu1 %373 }
  0x7e   :  { %v60_v51 = vld [vmem:[#allocation2] sm:$0xff]  ;;  %v376_v21 = vpop.permute.xlu0 %375 }
  0x7f   :  { %v61_v52 = vsel %vm1789_vm9, %v1689_v18, %v60_v51  ;;  %v1589_v51 = vld [vmem:[%s2051_s1 + $0xa8] sm:$0xff]  }
  0x80   :  { %62 = vst [vmem:[#allocation2] sm:$0xff] %v61_v52  ;;  %232 = vmatmul.mubr.bf16.vlgmr.msra.gmra.mrb[0].mxu0 %v61_v52 }
  0x81   :  { %1321 = vmatprep.mubr.msk.bf16.mxu0 %vm16_vm0, %v1699_v25  ;;  %v378_v22 = vpop.permute.xlu1 %377  ;;  %580 = vmatpush1.bf16.msra.mxu0 %v1580_v27 }
  0x82   :  { %v380_v23 = vpop.permute.xlu0 %379  ;;  %581 = vmatprep.subr.bf16.mxu0 %v1628_v2 }
  0x83   :  { %v66_v54 = vld [vmem:[#allocation2 + $0x10] sm:$0x1] }
  0x84   :  { %v67_v55 = vsel %vm1800_vm11, 0, %v66_v54 }
  0x85   :  { %68 = vst [vmem:[#allocation2 + $0x10] sm:$0x1] %v67_v55  ;;  %v382_v24 = vpop.permute.xlu1 %381  ;;  %582 = vmatpush1.bf16.msra.mxu0 %v1581_v29  ;;  %v464_v55 = vld [vmem:[#allocation4 + $0x8] sm:$0xff] }
  0x86   :  { %v384_v25 = vpop.permute.xlu0 %383  ;;  %583 = vmatprep.subr.bf16.mxu0 %v1628_v2 }
  0x89   :  { %v386_v26 = vpop.permute.xlu1 %385  ;;  %584 = vmatpush1.bf16.msra.mxu0 %v1582_v30 }
  0x8a   :  { %585 = vmatprep.subr.bf16.mxu0 %v1628_v2 }
  0x8c   :  { %v90_v56 = vld [vmem:[#allocation2 + $0x10] sm:$0xff] }
  0x8d   :  { %240 = vmatmul.mubr.bf16.gmra.mrb[4].mxu0 %v90_v56 }
  0x8e   :  { %586 = vmatpush1.bf16.msra.mxu0 %v1583_v31 }
  0x8f   :  { %587 = vmatprep.subr.bf16.mxu0 %v1628_v2 }
  0x92   :  { %588 = vmatpush1.bf16.msra.mxu0 %v1584_v32 }
  0x93   :  { %589 = vmatprep.subr.bf16.mxu0 %v1628_v2 }
  0x96   :  { %590 = vmatpush1.bf16.msra.mxu0 %v1585_v33 }
  0x97   :  { %591 = vmatprep.subr.bf16.mxu0 %v1628_v2 }
  0x9a   :  { %592 = vmatpush1.bf16.msra.mxu0 %v1586_v38 }
  0x9b   :  { %593 = vmatprep.subr.bf16.mxu0 %v1628_v2 }
  0x9e   :  { %594 = vmatpush1.bf16.msra.mxu0 %v1587_v39 }
  0x9f   :  { %595 = vmatprep.subr.bf16.mxu0 %v1628_v2 }
  0xa2   :  { %596 = vmatpush1.bf16.msra.mxu0 %v1588_v46 }
  0xa3   :  { %597 = vmatprep.subr.bf16.mxu0 %v1628_v2 }
  0xa6   :  { %598 = vmatpush1.bf16.msra.mxu0 %v1589_v51 }
  0xa7   :  { %599 = vmatprep.subr.bf16.mxu0 %v1628_v2 }
 0x153   :  { %v233_v58 = vpop.f32.mrb[0].mxu0 }
 0x154   :  { %v234_v59 = vadd.f32 %v1307_v57, %v233_v58  ;;  %v235_v60 = vpop.f32.mrb[1].mxu0  ;;  %v1590_v58 = vld [vmem:[%s2051_s1 + $0xb0] sm:$0xff]  }
 0x155   :  { %v236_v61 = vpop.f32.mrb[2].mxu0  ;;  %600 = vmatpush1.bf16.msra.mxu0 %v1590_v58  ;;  %v1591_v60 = vld [vmem:[%s2051_s1 + $0xb8] sm:$0xff]  }
 0x156   :  { %v248_v62 = vmax.f32 %v234_v59, 0.0  ;;  %v237_v63 = vadd.f32 %v1307_v57, %v236_v61  ;;  %v238_v0 = vpop.f32.mrb[3].mxu0  ;;  %601 = vmatprep.subr.bf16.mxu0 %v1628_v2  ;;  %v1592_v61 = vld [vmem:[%s2051_s1 + $0x100] sm:$0xff]   ;;  %v1594_v2 = vld [vmem:[%s2051_s1 + $0x110] sm:$0xff]  }
 0x157   :  { %733 = vrot.lane.b32.xlu1 %v1592_v61, %s1629_s22  ;;  %v1595_v0 = vld [vmem:[%s2051_s1 + $0x118] sm:$0xff]  }
 0x158   :  { %252 = vst [vmem:[#allocation3] sm:$0xff] %v248_v62  ;;  %v249_v1 = vmax.f32 %v237_v63, 0.0 }
 0x159   :  { %602 = vmatpush1.bf16.msra.mxu0 %v1591_v60  ;;  %v1604_v60 = vld [vmem:[%s2051_s1 + $0x190] sm:$0xff]  }
 0x15a   :  { %253 = vst [vmem:[#allocation3 + $0x8] sm:$0xff] %v249_v1  ;;  %1511 = vmatprep.subr.bf16.mxu0 %v1630_v28  ;;  %v1596_v1 = vld [vmem:[%s2051_s1 + $0x120] sm:$0xff]  }
 0x15b   :  { %737 = vrot.lane.b32.xlu1 %v1594_v2, %s1629_s22 }
 0x15f   :  { %741 = vrot.lane.b32.xlu1 %v1596_v1, %s1629_s22 }
 0x160   :  { %v241_v3 = vpop.f32.mrb[4].mxu0 }
 0x161   :  { %v242_v4 = vadd.f32 %v1307_v57, %v241_v3  ;;  %v243_v5 = vpop.f32.mrb[5].mxu0  ;;  %v256_v11 = vld [vmem:[#allocation3] ss:$2 sm:$0xff]  ;;  %v260_v12 = vld [vmem:[#allocation3 + $0x1] ss:$2 sm:$0xff] }
 0x162   :  { %v244_v6 = vpop.f32.mrb[6].mxu0  ;;  %v263_v16 = vmax.f32 %v256_v11, %v260_v12  ;;  %v1597_v3 = vld [vmem:[%s2051_s1 + $0x128] sm:$0xff]   ;;  %v1598_v5 = vld [vmem:[%s2051_s1 + $0x130] sm:$0xff]  }
 0x163   :  { %v250_v7 = vmax.f32 %v242_v4, 0.0  ;;  %v245_v8 = vadd.f32 %v1307_v57, %v244_v6  ;;  %v246_v9 = vpop.f32.mrb[7].mxu0  ;;  %v1599_v6 = vld [vmem:[%s2051_s1 + $0x138] sm:$0xff]   ;;  %745 = vrot.lane.b32.xlu1 %v1598_v5, %s1629_s22 }
 0x165   :  { %254 = vst [vmem:[#allocation3 + $0x10] sm:$0xff] %v250_v7  ;;  %v251_v10 = vmax.f32 %v245_v8, 0.0 }
 0x167   :  { %255 = vst [vmem:[#allocation3 + $0x18] sm:$0xff] %v251_v10 }
 0x16e   :  { %v258_v13 = vld [vmem:[#allocation3 + $0x10] ss:$2 sm:$0xff]  ;;  %v262_v14 = vld [vmem:[#allocation3 + $0x11] ss:$2 sm:$0xff] }
 0x16f   :  { %v264_v18 = vmax.f32 %v258_v13, %v262_v14 }
 0x171   :  { %v265_v19 = vpack.c.bf16 %v264_v18, %v263_v16 }
 0x173   :  { %1468 = vmatmul.mubr.bf16.vlgmr.msra.gmra.mrb[0].mxu1 %v265_v19 }
 0x174   :  { %1472 = vmatpush3.bf16.msra.mxu1 %v372_v15  ;;  %1487 = vmatprep.mubr.msk.bf16.mxu1 %vm1631_vm12, %v1630_v28 }
 0x175   :  { %1473 = vmatprep.subr.bf16.mxu1 %v1630_v28 }
 0x178   :  { %1474 = vmatpush3.bf16.msra.mxu1 %v374_v20 }
 0x179   :  { %1475 = vmatprep.subr.bf16.mxu1 %v1630_v28 }
 0x17c   :  { %1476 = vmatpush3.bf16.msra.mxu1 %v376_v21  ;;  %v1330_v21 = vld [vmem:[%s2052_s2 + $0x1] ss:$0 sm:$0xff] }
 0x17d   :  { %1477 = vmatprep.subr.bf16.mxu1 %v1630_v28 }
 0x180   :  { %1478 = vmatpush3.bf16.msra.mxu1 %v378_v22 }
 0x181   :  { %1479 = vmatprep.subr.bf16.mxu1 %v1630_v28 }
 0x184   :  { %1480 = vmatpush3.bf16.msra.mxu1 %v380_v23 }
 0x185   :  { %1481 = vmatprep.subr.bf16.mxu1 %v1630_v28 }
 0x188   :  { %1482 = vmatpush3.bf16.msra.mxu1 %v382_v24 }
 0x189   :  { %1483 = vmatprep.subr.bf16.mxu1 %v1630_v28 }
 0x18c   :  { %1484 = vmatpush3.bf16.msra.mxu1 %v384_v25 }
 0x18d   :  { %1485 = vmatprep.subr.bf16.mxu1 %v1630_v28 }
 0x190   :  { %1486 = vmatpush3.bf16.msra.mxu1 %v386_v26 }
 0x191   :  { %1491 = vmatprep.subr.bf16.mxu1 %v1630_v28 }
 0x193   :  { %1488 = vmatmul.mubr.bf16.vlgmr.msra.gmra.mrb[4].mxu1 %v265_v19 }
 0x194   :  { %1507 = vmatprep.mubr.msk.bf16.mxu1 %vm1631_vm12, %v1630_v28  ;;  %1492 = vmatpush3.bf16.msra.mxu1 %v1592_v61 }
 0x195   :  { %1493 = vmatprep.subr.bf16.mxu1 %v1630_v28 }
 0x198   :  { %1494 = vmatpush3.bf16.msra.mxu1 %v1593_v17 }
 0x199   :  { %1495 = vmatprep.subr.bf16.mxu1 %v1630_v28 }
 0x19c   :  { %1496 = vmatpush3.bf16.msra.mxu1 %v1594_v2 }
 0x19d   :  { %1497 = vmatprep.subr.bf16.mxu1 %v1630_v28 }
 0x1a0   :  { %1498 = vmatpush3.bf16.msra.mxu1 %v1595_v0 }
 0x1a1   :  { %1499 = vmatprep.subr.bf16.mxu1 %v1630_v28 }
 0x1a4   :  { %1500 = vmatpush3.bf16.msra.mxu1 %v1596_v1  ;;  %v1606_v1 = vld [vmem:[%s2051_s1 + $0x198] sm:$0xff]  }
 0x1a5   :  { %1501 = vmatprep.subr.bf16.mxu1 %v1630_v28 }
 0x1a8   :  { %1502 = vmatpush3.bf16.msra.mxu1 %v1597_v3 }
 0x1a9   :  { %1503 = vmatprep.subr.bf16.mxu1 %v1630_v28 }
 0x1ac   :  { %1504 = vmatpush3.bf16.msra.mxu1 %v1598_v5  ;;  %v1607_v5 = vld [vmem:[%s2051_s1 + $0x158] sm:$0xff]  }
 0x1ad   :  { %1505 = vmatprep.subr.bf16.mxu1 %v1630_v28 }
 0x1b0   :  { %1506 = vmatpush3.bf16.msra.mxu1 %v1599_v6 }
 0x1c9   :  { %v734_v12 = vpop.permute.xlu1 %733 }
 0x1cd   :  { %v738_v50 = vpop.permute.xlu1 %737 }
 0x1d1   :  { %v742_v16 = vpop.permute.xlu1 %741 }
 0x1d5   :  { %v746_v19 = vpop.permute.xlu1 %745 }
 0x246   :  { %v364_v34 = vpop.f32.mrb[0].mxu1 }
 0x247   :  { %v1469_v35 = vpop.f32.mrb[1].mxu1 }
 0x248   :  { %v367_v36 = vpop.f32.mrb[2].mxu1  ;;  %v1632_v35 = vmov 1966171168  }
 0x249   :  { %v1470_v37 = vpop.f32.mrb[3].mxu1 }
 0x24a   :  { %v806_v37 = vlaneseq }
 0x24c   :  { %v807_v39 = vshrl.u32 %v806_v37, 7 }
 0x266   :  { %v429_v40 = vpop.f32.mrb[4].mxu1 }
 0x267   :  { %v436_v41 = vmax.f32 %v364_v34, %v429_v40  ;;  %v1489_v42 = vpop.f32.mrb[5].mxu1  ;;  %v1600_v40 = vld [vmem:[%s2051_s1 + $0x180] sm:$0xff]  }
 0x268   :  { %v432_v43 = vpop.f32.mrb[6].mxu1  ;;  %1420 = vmatprep.subr.bf16.mxu1 %v1600_v40  ;;  %v1617_v40 = vld [vmem:[%s2051_s1 + $0x1c8] sm:$0xff]  }
 0x269   :  { %v437_v44 = vmax.f32 %v367_v36, %v432_v43  ;;  %v1490_v45 = vpop.f32.mrb[7].mxu1  ;;  %v804_v36 = vunpack.c.l.s4 %v1632_v35 }
 0x26b   :  { %v438_v47 = vpack.c.bf16 %v437_v44, %v436_v41  ;;  %v805_v38 = vunpack.c.0.s8 %v804_v36  ;;  %v1601_v41 = vld [vmem:[%s2051_s1 + $0x140] sm:$0xff]  }
 0x26d   :  { %v445_v48 = vshrl.u32 %v438_v47, 16  ;;  %v448_v49 = vshll.u32 %v438_v47, 16  ;;  %440 = vrot.lane.b32.xlu0 %v438_v47, %s1629_s22  ;;  %v1941_v45 = vsub.s32 %v805_v38, %v807_v39  ;;  %v1616_v39 = vld [vmem:[%s2051_s1 + $0x1c0] sm:$0xff]  }
 0x26f   :  { %v447_v52 = vrot.slane %v445_v48, 7  ;;  %v461_v54 = vrot.slane %v448_v49, 1 }
 0x271   :  { %v450_v56 = vor.u32 %v448_v49, %v447_v52  ;;  %v462_v57 = vor.u32 %v461_v54, %v445_v48  ;;  %735 = vrot.lane.b32.xlu0 %v1593_v17, %s1629_s22  ;;  %v799_v48 = vld [vmem:[#allocation6] sm:$0x1]  ;;  %v1602_v52 = vld [vmem:[%s2051_s1 + $0x188] sm:$0xff]  }
 0x273   :  { %v465_v59 = vsel %vm1685_vm2, %v462_v57, %v464_v55  ;;  %v1603_v57 = vld [vmem:[%s2051_s1 + $0x148] sm:$0xff]  }
 0x274   :  { %466 = vst [vmem:[#allocation4 + $0x8] sm:$0xff] %v465_v59 }
 0x275   :  { %739 = vrot.lane.b32.xlu0 %v1595_v0, %s1629_s22 }
 0x279   :  { %743 = vrot.lane.b32.xlu0 %v1597_v3, %s1629_s22 }
 0x27b   :  { %v470_v62 = vld [vmem:[#allocation4 + $0x8] sm:$0x8] }
 0x27c   :  { %v471_v63 = vsel %vm469_vm15, 0, %v470_v62  ;;  %v1605_v62 = vld [vmem:[%s2051_s1 + $0x150] sm:$0xff]  }
 0x27d   :  { %472 = vst [vmem:[#allocation4 + $0x8] sm:$0x8] %v471_v63  ;;  %747 = vrot.lane.b32.xlu0 %v1599_v6, %s1629_s22  ;;  %v839_v63 = vld [vmem:[#allocation6 + $0x1] sm:$0x1] }
 0x284   :  { %v474_v4 = vld [vmem:[#allocation4 + $0x8] sm:$0xff] }
 0x285   :  { %1343 = vmatprep.mubr.msk.bf16.mxu0 %vm16_vm0, %v474_v4  ;;  %vm455_vm0 = vcmask 520196  }
 0x286   :  { %vm457_vm2 = vmand %vm455_vm0, %vm456_vm1 }
 0x2df   :  { %v441_v7 = vpop.permute.xlu0 %440 }
 0x2e0   :  { %443 = vst.msk [vmem:[#allocation4] sm:$0xff] %vm36_vm7, %v441_v7  ;;  %v1608_v7 = vld [vmem:[%s2051_s1 + $0x1a0] sm:$0xff]   ;;  %vm1105_vm7 = vcmask 261120  }
 0x2e3   :  { %v736_v14 = vpop.permute.xlu0 %735 }
 0x2e7   :  { %v452_v8 = vld [vmem:[#allocation4] sm:$0xff]  ;;  %v740_v15 = vpop.permute.xlu0 %739 }
 0x2e8   :  { %v453_v9 = vsel %vm1789_vm9, %v450_v56, %v452_v8 }
 0x2e9   :  { %454 = vst [vmem:[#allocation4] sm:$0xff] %v453_v9  ;;  %v1610_v9 = vld [vmem:[%s2051_s1 + $0x1a8] sm:$0xff]  }
 0x2eb   :  { %v744_v18 = vpop.permute.xlu0 %743 }
 0x2ef   :  { %v748_v20 = vpop.permute.xlu0 %747 }
 0x2f0   :  { %v458_v10 = vld [vmem:[#allocation4] sm:$0x10] }
 0x2f1   :  { %v459_v11 = vsel %vm457_vm2, 0, %v458_v10  ;;  %v1611_v10 = vld [vmem:[%s2051_s1 + $0x168] sm:$0xff]  }
 0x2f2   :  { %460 = vst [vmem:[#allocation4] sm:$0x10] %v459_v11  ;;  %v1612_v11 = vld [vmem:[%s2051_s1 + $0x1b0] sm:$0xff]  }
 0x2f9   :  { %v473_v13 = vld [vmem:[#allocation4] sm:$0xff] }
 0x2fa   :  { %612 = vmatmul.mubr.bf16.vlgmr.msra.gmra.mrb[8].mxu0 %v473_v13  ;;  %v1614_v13 = vld [vmem:[%s2051_s1 + $0x1b8] sm:$0xff]  }
 0x2fb   :  { %1512 = vmatpush3.bf16.msra.mxu0 %v734_v12  ;;  %1527 = vmatprep.mubr.msk.bf16.mxu0 %vm1631_vm12, %v1630_v28  ;;  %v1613_v12 = vld [vmem:[%s2051_s1 + $0x170] sm:$0xff]  }
 0x2fc   :  { %1513 = vmatprep.subr.bf16.mxu0 %v1630_v28 }
 0x2ff   :  { %1514 = vmatpush3.bf16.msra.mxu0 %v736_v14  ;;  %v1615_v14 = vld [vmem:[%s2051_s1 + $0x178] sm:$0xff]  }
 0x300   :  { %1515 = vmatprep.subr.bf16.mxu0 %v1630_v28 }
 0x303   :  { %1516 = vmatpush3.bf16.msra.mxu0 %v738_v50 }
 0x304   :  { %1517 = vmatprep.subr.bf16.mxu0 %v1630_v28 }
 0x307   :  { %1518 = vmatpush3.bf16.msra.mxu0 %v740_v15 }
 0x308   :  { %1519 = vmatprep.subr.bf16.mxu0 %v1630_v28 }
 0x30b   :  { %1520 = vmatpush3.bf16.msra.mxu0 %v742_v16 }
 0x30c   :  { %1521 = vmatprep.subr.bf16.mxu0 %v1630_v28 }
 0x30f   :  { %1522 = vmatpush3.bf16.msra.mxu0 %v744_v18 }
 0x310   :  { %1523 = vmatprep.subr.bf16.mxu0 %v1630_v28 }
 0x313   :  { %1524 = vmatpush3.bf16.msra.mxu0 %v746_v19 }
 0x314   :  { %1525 = vmatprep.subr.bf16.mxu0 %v1630_v28 }
 0x317   :  { %1526 = vmatpush3.bf16.msra.mxu0 %v748_v20 }
 0x318   :  { %1531 = vmatprep.subr.bf16.mxu0 %v1630_v28 }
 0x3cd   :  { %v613_v22 = vpop.f32.mrb[8].mxu0 }
 0x3ce   :  { %v614_v23 = vadd.f32 %v1330_v21, %v613_v22  ;;  %v615_v24 = vpop.f32.mrb[9].mxu0 }
 0x3cf   :  { %v616_v25 = vpop.f32.mrb[10].mxu0 }
 0x3d0   :  { %v620_v26 = vmax.f32 %v614_v23, 0.0  ;;  %v617_v27 = vadd.f32 %v1330_v21, %v616_v25  ;;  %v618_v29 = vpop.f32.mrb[11].mxu0 }
 0x3d2   :  { %622 = vst [vmem:[#allocation5] sm:$0xff] %v620_v26  ;;  %v621_v30 = vmax.f32 %v617_v27, 0.0 }
 0x3d4   :  { %623 = vst [vmem:[#allocation5 + $0x8] sm:$0xff] %v621_v30 }
 0x3db   :  { %v624_v31 = vld [vmem:[#allocation5] ss:$2 sm:$0xff]  ;;  %v626_v32 = vld [vmem:[#allocation5 + $0x1] ss:$2 sm:$0xff] }
 0x3dc   :  { %v627_v33 = vmax.f32 %v624_v31, %v626_v32 }
 0x3de   :  { %v628_v34 = vpack.c.bf16 %v627_v33, %v627_v33 }
 0x3e0   :  { %1508 = vmatmul.mubr.bf16.vlgmr.msra.gmra.mrb[8].mxu1 %v628_v34  ;;  %1528 = vmatmul.mubr.bf16.vlgmr.msra.gmra.mrb[12].mxu0 %v628_v34 }
 0x3e1   :  { %1535 = vmatprep.mubr.msk.bf16.mxu0 %vm1631_vm12, %v1630_v28  ;;  %1421 = vmatpush3.bf16.msra.mxu1 %v1601_v41  ;;  %v1618_v41 = vld [vmem:[%s2051_s1 + $0x1d0] sm:$0xff]  }
 0x3e2   :  { %1422 = vmatprep.subr.bf16.mxu1 %v1602_v52  ;;  %1532 = vmatpush3.bf16.msra.mxu0 %v1616_v39  ;;  %v1619_v52 = vld [vmem:[%s2051_s1 + $0x1d8] sm:$0xff]  }
 0x3e3   :  { %1533 = vmatprep.subr.bf16.mxu0 %v1630_v28 }
 0x3e5   :  { %1423 = vmatpush3.bf16.msra.mxu1 %v1603_v57 }
 0x3e6   :  { %1424 = vmatprep.subr.bf16.mxu1 %v1604_v60  ;;  %1534 = vmatpush3.bf16.msra.mxu0 %v1617_v40 }
 0x3e7   :  { %1547 = vmatprep.subr.bf16.mxu0 %v1630_v28 }
 0x3e9   :  { %1425 = vmatpush3.bf16.msra.mxu1 %v1605_v62  ;;  %v1621_v62 = vld [vmem:[%s2051_s1 + $0x1e8] sm:$0xff]  }
 0x3ea   :  { %1426 = vmatprep.subr.bf16.mxu1 %v1606_v1 }
 0x3ed   :  { %1427 = vmatpush3.bf16.msra.mxu1 %v1607_v5 }
 0x3ee   :  { %1428 = vmatprep.subr.bf16.mxu1 %v1608_v7  ;;  %v1380_v7 = vld [vmem:[%s2052_s2 + $0x5] ss:$0 sm:$0xff] }
 0x3f1   :  { %1429 = vmatpush3.bf16.msra.mxu1 %v1609_v53 }
 0x3f2   :  { %1430 = vmatprep.subr.bf16.mxu1 %v1610_v9 }
 0x3f5   :  { %1431 = vmatpush3.bf16.msra.mxu1 %v1611_v10 }
 0x3f6   :  { %1432 = vmatprep.subr.bf16.mxu1 %v1612_v11 }
 0x3f9   :  { %1433 = vmatpush3.bf16.msra.mxu1 %v1613_v12 }
 0x3fa   :  { %1434 = vmatprep.subr.bf16.mxu1 %v1614_v13 }
 0x3fd   :  { %1435 = vmatpush3.bf16.msra.mxu1 %v1615_v14 }
 0x3fe   :  { %1539 = vmatprep.subr.bf16.mxu1 %v1630_v28 }
 0x4b3   :  { %v727_v42 = vpop.f32.mrb[8].mxu1  ;;  %v791_v43 = vpop.f32.mrb[12].mxu0 }
 0x4b4   :  { %v797_v44 = vmax.f32 %v727_v42, %v791_v43  ;;  %v1509_v46 = vpop.f32.mrb[9].mxu1  ;;  %v1529_v47 = vpop.f32.mrb[13].mxu0  ;;  %v1354_v43 = vld [vmem:[%s2052_s2 + $0x2] ss:$0 sm:$0xff] }
 0x4b5   :  { %v730_v49 = vpop.f32.mrb[10].mxu1  ;;  %v794_v51 = vpop.f32.mrb[14].mxu0 }
 0x4b6   :  { %v798_v54 = vpack.c.bf16 %v797_v44, %v797_v44  ;;  %v1510_v55 = vpop.f32.mrb[11].mxu1  ;;  %v1530_v56 = vpop.f32.mrb[15].mxu0 }
 0x4b7   :  { %v1372_v55 = vld [vmem:[%s2052_s2 + $0x3] ss:$0 sm:$0xff] }
 0x4b8   :  { %v800_v58 = vsel %vm1800_vm11, %v798_v54, %v799_v48  ;;  %v809_v59 = vrot.slane %v798_v54, %v1941_v45  ;;  %v1620_v54 = vld [vmem:[%s2051_s1 + $0x1e0] sm:$0xff]  }
 0x4b9   :  { %801 = vst [vmem:[#allocation6] sm:$0x1] %v800_v58 }
 0x4ba   :  { %v816_v61 = vrot.slane %v809_v59, %v1941_v45  ;;  %v830_v17 = vcombine.high %v809_v59, %v809_v59 }
 0x4bc   :  { %v837_v2 = vrot.slane %v830_v17, %v1941_v45  ;;  %v818_v0 = vshrl.u32 %v816_v61, 16  ;;  %v853_v6 = vcombine.high %v816_v61, %v816_v61 }
 0x4be   :  { %822 = vrot.lane.b32.xlu1 %v818_v0, %s1629_s22  ;;  %v843_v3 = vshrl.u32 %v837_v2, 16  ;;  %v840_v4 = vsel %vm1800_vm11, %v837_v2, %v839_v63  ;;  %v869_v8 = vcombine.high %v837_v2, %v837_v2  ;;  %v855_v21 = vshll.u32 %v853_v6, 16 }
 0x4bf   :  { %841 = vst [vmem:[#allocation6 + $0x1] sm:$0x1] %v840_v4  ;;  %vm1287_vm11 = vcmask 1041408  }
 0x4c0   :  { %847 = vrot.lane.b32.xlu0 %v843_v3, %s1629_s22  ;;  %v827_v15 = vld [vmem:[#allocation6] sm:$0x1]  ;;  %v871_v23 = vshll.u32 %v869_v8, 16 }
 0x4c2   :  { %862 = vrot.lane.b32.xlu1 %v853_v6, %s1629_s22  ;;  %v1282_v6 = vand.u32 127, %v806_v37 }
 0x4c4   :  { %877 = vrot.lane.b32.xlu0 %v869_v8, %s1629_s22  ;;  %vm1283_vm8 = vcmp.ge.s32.totalorder %v1282_v6, 16  ;;  %vm1284_vm9 = vcmp.lt.s32.totalorder %v1282_v6, 26 }
 0x4c5   :  { %vm1285_vm10 = vmand %vm1283_vm8, %vm1284_vm9 }
 0x4c6   :  { %v850_v19 = vld [vmem:[#allocation6 + $0x1] sm:$0x1] }
 0x530   :  { %v823_v50 = vpop.permute.xlu1 %822 }
 0x531   :  { %v828_v16 = vsel %vm826_vm5, %v823_v50, %v827_v15 }
 0x532   :  { %829 = vst [vmem:[#allocation6] sm:$0x1] %v828_v16  ;;  %v848_v18 = vpop.permute.xlu0 %847 }
 0x533   :  { %v851_v20 = vsel %vm826_vm5, %v848_v18, %v850_v19 }
 0x534   :  { %852 = vst [vmem:[#allocation6 + $0x1] sm:$0x1] %v851_v20  ;;  %v863_v27 = vpop.permute.xlu1 %862 }
 0x536   :  { %v878_v31 = vpop.permute.xlu0 %877 }
 0x539   :  { %v859_v22 = vld [vmem:[#allocation6] sm:$0x1] }
 0x53a   :  { %v860_v24 = vsel %vm858_vm6, %v855_v21, %v859_v22 }
 0x53b   :  { %861 = vst [vmem:[#allocation6] sm:$0x1] %v860_v24  ;;  %v874_v25 = vld [vmem:[#allocation6 + $0x1] sm:$0x1] }
 0x53c   :  { %v875_v26 = vsel %vm858_vm6, %v871_v23, %v874_v25 }
 0x53d   :  { %876 = vst [vmem:[#allocation6 + $0x1] sm:$0x1] %v875_v26 }
 0x542   :  { %v866_v29 = vld [vmem:[#allocation6] sm:$0x1] }
 0x543   :  { %v867_v30 = vsel %vm865_vm3, %v863_v27, %v866_v29 }
 0x544   :  { %868 = vst [vmem:[#allocation6] sm:$0x1] %v867_v30  ;;  %v880_v32 = vld [vmem:[#allocation6 + $0x1] sm:$0x1] }
 0x545   :  { %v881_v33 = vsel %vm865_vm3, %v878_v31, %v880_v32 }
 0x546   :  { %882 = vst [vmem:[#allocation6 + $0x1] sm:$0x1] %v881_v33 }
 0x54d   :  { %v1355_v34 = vld.sshfl [vmem:[#allocation6] sm:$0x11 pattern:$0x75316420] }
 0x54e   :  { %v929_v35 = vcombine.high %v1355_v34, %v1355_v34  ;;  %v936_v38 = vrot.slane %v1355_v34, %v1941_v45 }
 0x550   :  { %v943_v36 = vrot.slane %v929_v35, %v1941_v45 }
 0x552   :  { %1074 = vmatprep.mubr.bf16.mxu1 %v943_v36 }
 0x553   :  { %1075 = vmatmul.mubr.bf16.vlgmr.msra.gmra.mrb[12].mxu1 %v936_v38 }
 0x554   :  { %1543 = vmatprep.mubr.msk.bf16.mxu1 %vm1631_vm12, %v1630_v28  ;;  %1540 = vmatpush3.bf16.msra.mxu1 %v1618_v41 }
 0x555   :  { %1541 = vmatprep.subr.bf16.mxu1 %v1630_v28 }
 0x558   :  { %1542 = vmatpush3.bf16.msra.mxu1 %v1619_v52 }
 0x626   :  { %v1436_v42 = vpop.f32.mrb[12].mxu1 }
 0x627   :  { %v1437_v44 = vpop.f32.mrb[13].mxu1 }
 0x628   :  { %v1438_v45 = vadd.f32 %v1437_v44, %v1436_v42  ;;  %v1439_v46 = vpop.f32.mrb[14].mxu1 }
 0x629   :  { %v1440_v47 = vpop.f32.mrb[15].mxu1 }
 0x62a   :  { %v1077_v48 = vadd.f32 %v1438_v45, %v1354_v43 }
 0x62c   :  { %v1082_v49 = vmax.f32 %v1077_v48, 0.0 }
 0x62e   :  { %v1083_v51 = vpack.c.bf16 %v1082_v49, %v1082_v49 }
 0x630   :  { %1536 = vmatmul.mubr.msk.bf16.vlgmr.msra.gmra.mrb[16].mxu0 %vm1105_vm7, %v1083_v51 }
 0x631   :  { %1551 = vmatprep.mubr.msk.bf16.mxu0 %vm1631_vm12, %v1630_v28  ;;  %1548 = vmatpush3.bf16.msra.mxu0 %v1620_v54  ;;  %vm1299_vm12 = vcmp.lt.s32.totalorder %v1282_v6, 16 }
 0x632   :  { %1549 = vmatprep.subr.bf16.mxu0 %v1630_v28  ;;  %v1376_v28 = vld [vmem:[%s2052_s2 + $0x4] ss:$0 sm:$0xff] }
 0x635   :  { %1550 = vmatpush3.bf16.msra.mxu0 %v1621_v62 }
 0x703   :  { %v1143_v56 = vpop.f32.mrb[16].mxu0 }
 0x704   :  { %v1144_v57 = vadd.f32 %v1372_v55, %v1143_v56  ;;  %v1537_v58 = vpop.f32.mrb[17].mxu0 }
 0x705   :  { %v1146_v59 = vpop.f32.mrb[18].mxu0 }
 0x706   :  { %v1149_v60 = vmax.f32 %v1144_v57, 0.0  ;;  %v1538_v61 = vpop.f32.mrb[19].mxu0 }
 0x708   :  { %v1150_v17 = vpack.c.bf16 %v1149_v60, %v1149_v60 }
 0x70a   :  { %1544 = vmatmul.mubr.msk.bf16.vlgmr.msra.gmra.mrb[16].mxu1 %vm1105_vm7, %v1150_v17 }
 0x7dd   :  { %v1209_v63 = vpop.f32.mrb[16].mxu1 }
 0x7de   :  { %v1210_v2 = vadd.f32 %v1376_v28, %v1209_v63  ;;  %v1545_v0 = vpop.f32.mrb[17].mxu1 }
 0x7df   :  { %v1212_v1 = vpop.f32.mrb[18].mxu1 }
 0x7e0   :  { %v1215_v3 = vmax.f32 %v1210_v2, 0.0  ;;  %v1546_v4 = vpop.f32.mrb[19].mxu1 }
 0x7e2   :  { %v1216_v5 = vpack.c.bf16 %v1215_v3, %v1215_v3 }
 0x7e4   :  { %1552 = vmatmul.mubr.msk.bf16.vlgmr.msra.gmra.mrb[20].mxu0 %vm1105_vm7, %v1216_v5 }
 0x8b7   :  { %v1275_v8 = vpop.f32.mrb[20].mxu0 }
 0x8b8   :  { %v1276_v53 = vadd.f32 %v1380_v7, %v1275_v8  ;;  %v1553_v9 = vpop.f32.mrb[21].mxu0 }
 0x8b9   :  { %v1278_v10 = vpop.f32.mrb[22].mxu0 }
 0x8ba   :  { %v1554_v11 = vpop.f32.mrb[23].mxu0  ;;  %v1286_v12 = vsel %vm1285_vm10, %v1276_v53, -inf }
 0x8bb   :  { %v1288_v13 = vsel %vm1287_vm11, %v1286_v12, -inf }
 0x8bc   :  { %1289 = vmax.xlane.f32.xlu1 %v1288_v13 }
 0x949   :  { %v1290_v14 = vpop.xlane.xlu1 %1289 }
 0x94a   :  { %v1291_v50 = vsub.f32 %v1286_v12, %v1290_v14 }
 0x94c   :  { %v1292_v15 = vmul.f32 1.442695, %v1291_v50 }
 0x94e   :  { %1622 = vpow2.f32 %v1292_v15 }
 0x958   :  { %v1623_v37 = vpop.eup %1622 }
 0x959   :  { %v1294_v16 = vsel %vm1287_vm11, %v1623_v37, 0.0 }
 0x95a   :  { %1295 = vadd.xlane.f32.xlu0 %v1294_v16 }
 0x9e7   :  { %v1296_v18 = vpop.xlane.xlu0 %1295 }
 0x9e8   :  { %1624 = vrcp.f32 %v1296_v18 }
 0x9e9   :  { %1626 = vtanh.f32 %v1276_v53 }
 0x9f2   :  { %v1625_v19 = vpop.eup %1624 }
 0x9f3   :  { %v1298_v20 = vmul.f32 %v1625_v19, %v1623_v37  ;;  %v1627_v21 = vpop.eup %1626 }
 0x9f5   :  { %v1301_v22 = vsel %vm1299_vm12, %v1627_v21, %v1298_v20 }
 0x9f6   :  { %1302 = vst [vmem:[%s2053_s3] sm:$0x3] %v1301_v22 }

</bundles_post_ra>
